<compile_context>
chip_gen: v7x
topology: tpu7x:2x2x1
jax: 0.10.0
libtpu: 0.0.40
codegen_flags: <defaults>
</compile_context>

<pallas_src>
import functools

import jax
import jax.numpy as jnp
from jax.experimental import pallas as pl
from jax.experimental.pallas import tpu as pltpu

_LANE = 128      # lane width: 128-multiples in the last dim -> unmasked stores
_SUBLANE = 8     # f32 sublane multiple


def _round_up(x, m):
    return (x + m - 1) // m * m


def mlp_kernel(x_ref, w1_ref, b1_ref, w2_ref, b2_ref, o_ref):
    # fc1: (tb, I) @ (I, Hp), bf16 operands, f32 accumulate on the MXU.
    x = x_ref[...].astype(w1_ref.dtype)
    h = jnp.dot(x, w1_ref[...], preferred_element_type=jnp.float32)
    # bias + ReLU on the VPU, in f32.
    h = jnp.maximum(h + b1_ref[...], 0.0)
    # fc2: (tb, Hp) @ (Hp, Op), bf16 operands, f32 accumulate.
    y = jnp.dot(h.astype(w2_ref.dtype), w2_ref[...],
                preferred_element_type=jnp.float32)
    y = y + b2_ref[...]
    o_ref[...] = y.astype(o_ref.dtype)


def prepare_mlp_params(w1, b1, w2, b2, *, param_dtype=jnp.bfloat16):
    """One-time parameter prep (outside the hot path).

    PyTorch nn.Linear layouts: w1 (hidden, input), b1 (hidden,),
    w2 (output, hidden), b2 (output,).

    Returns (params_dict_of_arrays, out_dim).  Weights are transposed,
    lane-padded on their output dims (zeros) and cast to bf16; biases stay f32.
    The dict contains ONLY arrays so it can be passed through jit safely.
    """
    hidden, in_dim = w1.shape
    out_dim = w2.shape[0]
    hid_p = _round_up(hidden, _LANE)
    out_p = _round_up(out_dim, _LANE)

    w1_t = jnp.zeros((in_dim, hid_p), param_dtype).at[:, :hidden].set(
        w1.T.astype(param_dtype))
    b1_r = jnp.zeros((1, hid_p), jnp.float32).at[0, :hidden].set(
        b1.astype(jnp.float32))
    w2_t = jnp.zeros((hid_p, out_p), param_dtype).at[:hidden, :out_dim].set(
        w2.T.astype(param_dtype))
    b2_r = jnp.zeros((1, out_p), jnp.float32).at[0, :out_dim].set(
        b2.astype(jnp.float32))

    params = {"w1_t": w1_t, "b1": b1_r, "w2_t": w2_t, "b2": b2_r}
    return params, out_dim


def _vmem_cap_bytes():
    """75% of physical VMEM (headroom for compiler scratch); 48 MiB fallback."""
    try:
        cap = int(pltpu.get_tpu_info().vmem_capacity_bytes)
        return max(16 * 1024 * 1024, (cap * 3) // 4)
    except Exception:  # e.g. interpret mode / no TPU visible at trace time
        return 48 * 1024 * 1024


@functools.partial(jax.jit, static_argnames=("out_dim", "block_batch"))
def mlp_forward(x, params, *, out_dim, block_batch=512):
    """x: (B, input_size).  params/out_dim: output of prepare_mlp_params."""
    B, in_dim = x.shape
    w1_t, b1_r = params["w1_t"], params["b1"]
    w2_t, b2_r = params["w2_t"], params["b2"]
    assert w1_t.shape[0] == in_dim, "x feature dim does not match prepared W1"
    hid_p = w1_t.shape[1]
    out_p = w2_t.shape[1]

    # Batch tile: multiple of 8 (f32 sublane), default up to 512 rows.
    tb = min(_round_up(block_batch, _SUBLANE), _round_up(B, _SUBLANE))
    num_tiles = pl.cdiv(B, tb)
    # Prefer >= 2 tiles so the "parallel" axis can shard across v7x's 2 TCs.
    if num_tiles == 1 and B > _SUBLANE:
        tb = _round_up(pl.cdiv(B, 2), _SUBLANE)
        num_tiles = pl.cdiv(B, tb)

    # VMEM budget: weights/biases single-buffered, x/out tiles double-buffered,
    # +25% margin, capped generation-aware.
    wdt = jnp.dtype(w1_t.dtype).itemsize
    fdt = jnp.dtype(jnp.float32).itemsize
    xdt = jnp.dtype(x.dtype).itemsize
    footprint = (
        wdt * (in_dim * hid_p + hid_p * out_p)        # W1^T, W2^T (Buffered(1))
        + fdt * (hid_p + out_p)                       # biases
        + 2 * xdt * tb * in_dim                       # x tiles (double buffered)
        + 2 * xdt * tb * out_p                        # out tiles
    )
    vmem_limit = int(min(_vmem_cap_bytes(),
                         max((footprint * 5) // 4, 8 * 1024 * 1024)))

    resident = lambda shape: pl.BlockSpec(shape, lambda i: (0, 0),
                                          pipeline_mode=pl.Buffered(1))

    out_padded = pl.pallas_call(
        mlp_kernel,
        out_shape=jax.ShapeDtypeStruct((B, out_p), x.dtype),
        grid_spec=pltpu.PrefetchScalarGridSpec(
            num_scalar_prefetch=0,
            grid=(num_tiles,),
            in_specs=[
                pl.BlockSpec((tb, in_dim), lambda i: (i, 0)),   # x tile
                resident((in_dim, hid_p)),                      # W1^T
                resident((1, hid_p)),                           # b1
                resident((hid_p, out_p)),                       # W2^T
                resident((1, out_p)),                           # b2
            ],
            out_specs=pl.BlockSpec((tb, out_p), lambda i: (i, 0)),  # lane-dense
        ),
        compiler_params=pltpu.CompilerParams(
            dimension_semantics=("parallel",),
            vmem_limit_bytes=vmem_limit,
        ),
    )(x, w1_t, b1_r, w2_t, b2_r)

    # Only the padded output columns need slicing; OOB batch rows of the last
    # grid block were masked by Pallas on store.
    if out_p != out_dim:
        out_padded = out_padded[:, :out_dim]
    return out_padded


def mlp_reference(x, w1, b1, w2, b2):
    h = jnp.maximum(x @ w1.T + b1, 0.0)
    return h @ w2.T + b2


if __name__ == "__main__":
    # Small shapes consistent with the MLP module; B=24 deliberately not a
    # multiple of the batch tile to exercise the cdiv / partial-block path.
    B, input_size, hidden_size, output_size = 24, 32, 64, 16

    key = jax.random.PRNGKey(0)
    kx, kw1, kb1, kw2, kb2 = jax.random.split(key, 5)

    x = jax.random.normal(kx, (B, input_size), dtype=jnp.float32)
    # PyTorch nn.Linear layouts: weight (out, in), bias (out,).
    w1 = jax.random.normal(kw1, (hidden_size, input_size), dtype=jnp.float32) * 0.1
    b1 = jax.random.normal(kb1, (hidden_size,), dtype=jnp.float32) * 0.1
    w2 = jax.random.normal(kw2, (output_size, hidden_size), dtype=jnp.float32) * 0.1
    b2 = jax.random.normal(kb2, (output_size,), dtype=jnp.float32) * 0.1

    # One-time prep (outside the hot path): transpose, lane-pad, cast to bf16.
    params, out_dim = prepare_mlp_params(w1, b1, w2, b2)

    # Small block_batch here only to exercise a multi-step grid at tiny B;
    # production default is 512.
    out = mlp_forward(x, params, out_dim=out_dim, block_batch=16)
    out = jax.block_until_ready(out)

    ref = mlp_reference(x, w1, b1, w2, b2)
    assert out.shape == (B, output_size)
    # bf16 weights/activations on the MXU -> tolerance loosened accordingly.
    assert jnp.allclose(out, ref, atol=2e-2, rtol=2e-2), "mismatch vs reference"

    print("KERNEL_OK")
</pallas_src>

<mosaic_0001>
module attributes {stable_mosaic.version = 11 : i64} {
  func.func @mlp_kernel(%arg0: i32, %arg1: memref<16x32xf32, #tpu.memory_space<vmem>>, %arg2: memref<32x128xbf16, #tpu.memory_space<vmem>>, %arg3: memref<1x128xf32, #tpu.memory_space<vmem>>, %arg4: memref<128x128xbf16, #tpu.memory_space<vmem>>, %arg5: memref<1x128xf32, #tpu.memory_space<vmem>>, %arg6: memref<16x128xf32, #tpu.memory_space<vmem>>) attributes {dimension_semantics = [#tpu.dimension_semantics<parallel>], iteration_bounds = array<i64: 2>, scalar_prefetch = 0 : i64, scratch_operands = 0 : i64, tpu.core_type = #tpu.core_type<tc>, window_params = [{transform_indices = @transform_0, window_bounds = array<i64: 16, 32>}, {pipeline_mode = #tpu.pipeline_mode<synchronous>, transform_indices = @transform_1, window_bounds = array<i64: 32, 128>}, {pipeline_mode = #tpu.pipeline_mode<synchronous>, transform_indices = @transform_2, window_bounds = array<i64: 1, 128>}, {pipeline_mode = #tpu.pipeline_mode<synchronous>, transform_indices = @transform_3, window_bounds = array<i64: 128, 128>}, {pipeline_mode = #tpu.pipeline_mode<synchronous>, transform_indices = @transform_4, window_bounds = array<i64: 1, 128>}, {transform_indices = @transform_5, window_bounds = array<i64: 16, 128>}]} {
    %c0 = arith.constant 0 : index
    %c0_0 = arith.constant 0 : index
    %0 = vector.load %arg1[%c0, %c0_0] : memref<16x32xf32, #tpu.memory_space<vmem>>, vector<16x32xf32>
    %1 = arith.truncf %0 : vector<16x32xf32> to vector<16x32xbf16>
    %c0_1 = arith.constant 0 : index
    %c0_2 = arith.constant 0 : index
    %2 = vector.load %arg2[%c0_1, %c0_2] : memref<32x128xbf16, #tpu.memory_space<vmem>>, vector<32x128xbf16>
    %cst = arith.constant dense<0.000000e+00> : vector<16x128xf32>
    %3 = tpu.matmul %1, %2, %cst {dimension_numbers = #tpu.dot_dimension_numbers<[1], [0], [0], [1], [0, 0, 1, 1], [], []>} : vector<16x32xbf16>, vector<32x128xbf16>, vector<16x128xf32> -> vector<16x128xf32>
    %c0_3 = arith.constant 0 : index
    %c0_4 = arith.constant 0 : index
    %4 = vector.load %arg3[%c0_3, %c0_4] : memref<1x128xf32, #tpu.memory_space<vmem>>, vector<1x128xf32>
    %5 = vector.broadcast %4 : vector<1x128xf32> to vector<16x128xf32>
    %6 = arith.addf %3, %5 : vector<16x128xf32>
    %cst_5 = arith.constant 0.000000e+00 : f32
    %7 = vector.broadcast %cst_5 : f32 to vector<16x128xf32>
    %8 = arith.maximumf %6, %7 : vector<16x128xf32>
    %9 = arith.truncf %8 : vector<16x128xf32> to vector<16x128xbf16>
    %c0_6 = arith.constant 0 : index
    %c0_7 = arith.constant 0 : index
    %10 = vector.load %arg4[%c0_6, %c0_7] : memref<128x128xbf16, #tpu.memory_space<vmem>>, vector<128x128xbf16>
    %cst_8 = arith.constant dense<0.000000e+00> : vector<16x128xf32>
    %11 = tpu.matmul %9, %10, %cst_8 {dimension_numbers = #tpu.dot_dimension_numbers<[1], [0], [0], [1], [0, 0, 1, 1], [], []>} : vector<16x128xbf16>, vector<128x128xbf16>, vector<16x128xf32> -> vector<16x128xf32>
    %c0_9 = arith.constant 0 : index
    %c0_10 = arith.constant 0 : index
    %12 = vector.load %arg5[%c0_9, %c0_10] : memref<1x128xf32, #tpu.memory_space<vmem>>, vector<1x128xf32>
    %13 = vector.broadcast %12 : vector<1x128xf32> to vector<16x128xf32>
    %14 = arith.addf %11, %13 : vector<16x128xf32>
    %c0_11 = arith.constant 0 : index
    %c0_12 = arith.constant 0 : index
    %15 = vector.load %arg6[%c0_11, %c0_12] : memref<16x128xf32, #tpu.memory_space<vmem>>, vector<16x128xf32>
    tpu.vector_store %arg6[%c0_11, %c0_12], %14 {strides = array<i32>} : memref<16x128xf32, #tpu.memory_space<vmem>>, vector<16x128xf32>,
    return
  }
  func.func @transform_0(%arg0: i32) -> (i32, i32) {
    %c0_i32 = arith.constant 0 : i32
    %c0_i32_0 = arith.constant 0 : i32
    return %arg0, %c0_i32 : i32, i32
  }
  func.func @transform_1(%arg0: i32) -> (i32, i32) {
    %c0_i32 = arith.constant 0 : i32
    %c0_i32_0 = arith.constant 0 : i32
    %c0_i32_1 = arith.constant 0 : i32
    return %c0_i32, %c0_i32_0 : i32, i32
  }
  func.func @transform_2(%arg0: i32) -> (i32, i32) {
    %c0_i32 = arith.constant 0 : i32
    %c0_i32_0 = arith.constant 0 : i32
    %c0_i32_1 = arith.constant 0 : i32
    return %c0_i32, %c0_i32_0 : i32, i32
  }
  func.func @transform_3(%arg0: i32) -> (i32, i32) {
    %c0_i32 = arith.constant 0 : i32
    %c0_i32_0 = arith.constant 0 : i32
    %c0_i32_1 = arith.constant 0 : i32
    return %c0_i32, %c0_i32_0 : i32, i32
  }
  func.func @transform_4(%arg0: i32) -> (i32, i32) {
    %c0_i32 = arith.constant 0 : i32
    %c0_i32_0 = arith.constant 0 : i32
    %c0_i32_1 = arith.constant 0 : i32
    return %c0_i32, %c0_i32_0 : i32, i32
  }
  func.func @transform_5(%arg0: i32) -> (i32, i32) {
    %c0_i32 = arith.constant 0 : i32
    %c0_i32_0 = arith.constant 0 : i32
    return %arg0, %c0_i32 : i32, i32
  }
}

</mosaic_0001>

<bundles_post_ra>
// kernel: mlp_forward.1
= control target key start
LH: loop header
LB: loop body
LE: loop exit
PB: predicated region body
PF: predicated region fallthrough
CT: control target
= control target key end

     0   :  { %10 = vsyncpa [#allocation3], 0  ;;  %s1401_s0 = inlined_call_operand.hbm [shape: f32[24,32], index: 0, kind: input, shape index: {}]   ;;  %s1402_s1 = inlined_call_operand.hbm [shape: bf16[32,128], index: 1, kind: input, shape index: {}]   ;;  %s1403_s2 = inlined_call_operand.vmem [shape: f32[1,128], index: 2, kind: input, shape index: {}]   ;;  %s1404_s3 = inlined_call_operand.hbm [shape: bf16[128,128], index: 3, kind: input, shape index: {}]   ;;  %s1405_s4 = inlined_call_operand.vmem [shape: f32[1,128], index: 4, kind: input, shape index: {}]   ;;  %s1406_s5 = inlined_call_operand.vmem [shape: f32[24,128], index: 5, kind: output, shape index: {}]  }
   0x1   :  { %12 = vsyncpa [#allocation3 + $0x1], 0 }
   0x2   :  { %13 = vsyncpa [#allocation5], 0  ;;  %s1174_s18 = smov 0   ;;  %s1176_s19 = smov 0  }
   0x3   :  { %s1178_s20 = smov 0   ;;  %s1180_s21 = smov 0  }
   0x4 LB: > { %s1193_s22 = sadd.s32 4294967295, %s1101_s21   ;;  %s1196_s23 = sadd.s32 1, %s1101_s21   ;;  %s1101_s21 = sphi %s1180_s21, %s1424_s21   ;;  %s1097_s20 = sphi %s1178_s20, %s1423_s20   ;;  %s1093_s19 = sphi %s1176_s19, %s1422_s19   ;;  %s1089_s18 = sphi %s1174_s18, %s1421_s18  }
   0x5   : > { %s23_s24 = ssub.s32 %s1101_s21, %s1196_s23  ;;  %s26_s25 = sadd.s32 1, %s1097_s20 }
   0x6   : > { %p24_p0 = scmp.eq.s32.totalorder %s23_s24, 0  ;;  %p33_p1 = scmp.ne.s32.totalorder %s1097_s20, %s1093_s19 }
   0x7   : > { %p34_p2 = scmp.eq.s32.totalorder %s1101_s21, 0  ;;  %p39_p3 = scmp.ne.s32.totalorder %s1093_s19, %s1089_s18 }
   0x8   : > { %s1206_s26 = scalar_select %p24_p0, %s1097_s20, %s26_s25  }
   0x9   : > { %p1208_p4 = por %p34_p2, %p33_p1  ;;  %p1407_p5 = scmp.eq.s32.totalorder %s1193_s22, 0 }
   0xa   : > { %p147_p6 = scmp.eq.s32.totalorder %s1193_s22, 1  ;;  %p723_p7 = scmp.ge.s32.totalorder %s1101_s21, 1 }
   0xb   : > { %s1410_s27 = scalar_select %p1208_p4, 1, 0 }
   0xc   : > { %p1217_p8 = por %p1407_p5, %p39_p3  ;;  %p160_p9 = scmp.lt.s32.totalorder %s1101_s21, 3 }
   0xd   : > { %p1222_p10 = por %p147_p6, %p33_p1  ;;  %s1135_s6 = smov [#allocation4]  }
   0xe   : > { %s1411_s28 = scalar_select %p1217_p8, 1, 0 }
   0xf   : > { %s1412_s29 = scalar_select %p1222_p10, 1, 0 }
  0x10   : > { %p1226_p11 = pnand %p723_p7, %p160_p9  ;;  %s172_s7 = sshll.u32 %s1135_s6, 4  ;;  %s173_s7 = int_to_ptr.vmem [resolvable:$true] %s172_s7 }
  0x11   : > { %s1136_s9 = smov [#allocation6]   ;;  %s947_s13 = scalar_lea.hbm %s1402_s1, 256 }
  0x12   : > { %s1413_s30 = scalar_select %p1226_p11, 1, 0 }
  0x13   : > { %p822_p12 = pneg %p1226_p11  ;;  %s188_s10 = sshll.u32 %s1136_s9, 4  ;;  %s1238_s10 = int_to_ptr.vmem [resolvable:$true] %s188_s10 }
  0x14   : > { %p948_p0 = scmp.ne.s32.totalorder %s1402_s1, %s947_s13  ;;  %p954_p6 = scmp.lt.u32.totalorder %s947_s13, %s1402_s1 }
  0x15   : > { %p1234_p13 = pnand %p822_p12, %p1407_p5 }
  0x17   : > { %p949_p1 = pneg %p1234_p13 }
  0x19   : > { %p950_p2 = pnand %p949_p1, %p948_p0 }
  0x1b   : > { %p951_p3 = pneg %p950_p2 }
  0x1d   : > { %p956_p7 = pnand %p954_p6, %p951_p3 }
  0x1f   : > { %959 = shalt.err (!%p956_p7)
}
  0x20   : > { %s960_s18 = scalar_lea.vmem %s173_s7, 256  ;;  %p968_p10 = scmp.lt.s32.totalorder %s173_s7, %s173_s7 }
  0x21   : > { %p961_p9 = scmp.ne.s32.totalorder %s173_s7, %s960_s18  ;;  %p969_p8 = scmp.lt.s32.totalorder %s960_s18, %s960_s18 }
  0x23   : > { %p963_p12 = pnand %p961_p9, %p949_p1  ;;  %p970_p11 = por %p969_p8, %p968_p10 }
  0x25   : > { %p964_p5 = pneg %p963_p12 }
  0x27   : > { %p971_p4 = pnand %p970_p11, %p964_p5 }
  0x29   : > { %974 = shalt.err (!%p971_p4)
}
  0x2a   : > { %s1137_s24 = smov 64   ;;  %s1138_s25 = smov 4  }
  0x2b   : > { %825 = dma.hbm_to_vmem [thread:$0]  (!%p1234_p13), %s1402_s1, 256, %s173_s7, [#allocation5], %s1137_s24, %s1137_s24, %s1138_s25  }
  0x2c   : > { %s975_s13 = scalar_lea.hbm %s1404_s3, 1024 }
  0x2d   : > { %p976_p0 = scmp.ne.s32.totalorder %s1404_s3, %s975_s13  ;;  %p982_p8 = scmp.lt.u32.totalorder %s975_s13, %s1404_s3 }
  0x2f   : > { %p978_p4 = pnand %p976_p0, %p949_p1 }
  0x31   : > { %p979_p5 = pneg %p978_p4 }
  0x33   : > { %p984_p10 = pnand %p982_p8, %p979_p5 }
  0x35   : > { %987 = shalt.err (!%p984_p10)
}
  0x36   : > { %s988_s7 = scalar_lea.vmem %s1238_s10, 1024  ;;  %p996_p6 = scmp.lt.s32.totalorder %s1238_s10, %s1238_s10 }
  0x37   : > { %p989_p11 = scmp.ne.s32.totalorder %s1238_s10, %s988_s7  ;;  %p997_p7 = scmp.lt.s32.totalorder %s988_s7, %s988_s7 }
  0x39   : > { %p991_p2 = pnand %p989_p11, %p949_p1  ;;  %p998_p9 = por %p997_p7, %p996_p6 }
  0x3b   : > { %p992_p3 = pneg %p991_p2 }
  0x3d   : > { %p999_p12 = pnand %p998_p9, %p992_p3 }
  0x3f   : > { %1002 = shalt.err (!%p999_p12)
}
  0x40   : > { %828 = dma.hbm_to_vmem [thread:$0]  (!%p1234_p13), %s1404_s3, 1024, %s1238_s10, [#allocation5], %s1137_s24, %s1137_s24, %s1138_s25  }
  0x41   : > { %p726_p0 = scmp.ge.s32.totalorder %s1101_s21, 2 }
  0x42   : > { %p1415_p4 = scmp.ne.s32.totalorder (!%p726_p0), %s1410_s27, 0 }
  0x43   : > { %201 = sbr.rel (%p726_p0) target bundleno = 109 (0x6d), region = 32 }
  0x4a   : > { %204 = sbr.rel (!%p1415_p4) target bundleno = 109 (0x6d), region = 36  ;;  %s205_s9 = sand.u32 (%p1415_p4), 1, %s1097_s20  }
  0x4b   : > { %s728_s11 = sshll.u32 (%p1415_p4), %s1101_s21, 1  ;;  %s727_s12 = sshll.u32 (%p1415_p4), %s205_s9, 4 }
  0x4c   : > { %s211_s13 = ssub.s32 (%p1415_p4), 3, %s728_s11  ;;  %s1295_s15 = scalar_lea.sflag (%p1415_p4), [#allocation3], %s205_s9 }
  0x4d   : > { %p212_p1 = scmp.lt.s32.totalorder (%p1415_p4), %s211_s13, 2  ;;  %s209_s10 = scalar_lea.vmem (%p1415_p4), [#allocation2], %s727_s12 }
  0x51   : > { %s1426_s13 = smov (!%p212_p1, %s211_s13), 2 }
  0x52   : > { %s1292_s8 = sshll.u32 %s1426_s13, 7 }
  0x53   : > { %s216_s14 = ssub.s32 256, %s1292_s8 }
  0x54   : > { %217 = vsyncadd %s1295_s15, %s216_s14  ;;  %p730_p13 = scmp.ne.s32.totalorder %s1292_s8, 0  ;;  %s769_s27 = sshll.u32 %s1101_s21, 8 }
  0x55   : > { %s1303_s16 = scalar_lea.hbm %s1401_s0, %s769_s27  ;;  %s222_s17 = sshll.u32 %s209_s10, 4  ;;  %s1305_s17 = int_to_ptr.vmem [resolvable:$true] %s222_s17 }
  0x56   : > { %s1003_s7 = scalar_lea.hbm %s1303_s16, %s1292_s8  ;;  %s1007_s21 = scalar_lea.hbm %s1401_s0, 384 }
  0x57   : > { %p1004_p5 = scmp.ne.s32.totalorder %s1303_s16, %s1003_s7  ;;  %p1008_p11 = scmp.lt.u32.totalorder %s1303_s16, %s1401_s0 }
  0x58   : > { %p1009_p2 = scmp.lt.u32.totalorder %s1007_s21, %s1003_s7  ;;  %p1011_p6 = scmp.lt.u32.totalorder %s1003_s7, %s1303_s16 }
  0x59   : > { %p1005_p8 = pnand %p1004_p5, %p730_p13 }
  0x5a   : > { %p1010_p3 = por %p1009_p2, %p1008_p11 }
  0x5b   : > { %p1006_p10 = pneg %p1005_p8 }
  0x5c   : > { %p1012_p7 = por %p1011_p6, %p1010_p3 }
  0x5e   : > { %p1013_p9 = pnand %p1012_p7, %p1006_p10 }
  0x60   : > { %1016 = shalt.err (!%p1013_p9)
}
  0x61   : > { %s1017_s12 = scalar_lea.vmem %s1305_s17, %s1292_s8  ;;  %s1139_s13 = smov [#allocation2]  }
  0x62   : > { %p1018_p12 = scmp.ne.s32.totalorder %s1305_s17, %s1017_s12  ;;  %s1021_s14 = sshll.u32 %s1139_s13, 4  ;;  %s1022_s14 = int_to_ptr.vmem [resolvable:$false] %s1021_s14 }
  0x63   : > { %s1023_s10 = scalar_lea.vmem %s1022_s14, 512  ;;  %p1024_p1 = scmp.lt.s32.totalorder %s1305_s17, %s1022_s14 }
  0x64   : > { %p1019_p0 = pnand %p1018_p12, %p730_p13  ;;  %p1025_p5 = scmp.lt.s32.totalorder %s1023_s10, %s1017_s12 }
  0x66   : > { %p1020_p4 = pneg %p1019_p0  ;;  %p1026_p8 = por %p1025_p5, %p1024_p1 }
  0x68   : > { %p1027_p11 = pnand %p1026_p8, %p1020_p4 }
  0x6a   : > { %1030 = shalt.err (!%p1027_p11)
}
  0x6b   : > { %s1140_s27 = smov 128   ;;  %s1141_s24 = smov 8  }
  0x6c   : > { %228 = dma.hbm_to_vmem [thread:$0]  (%p730_p13), %s1303_s16, %s1292_s8, %s1305_s17, %s1295_s15, %s1140_s27, %s1140_s27, %s1141_s24  }
  0x6d PF: > { %p1416_p10 = scmp.ne.s32.totalorder %s1413_s30, 0 }
  0x6e   : > { %s236_s25 = sand.u32 (!%p1416_p10), 1, %s1093_s19   ;;  %p1417_p2 = scmp.ne.s32.totalorder (!%p1416_p10), %s1411_s28, 0 }
  0x6f   : > { %234 = sbr.rel (%p1416_p10) target bundleno = 618 (0x26a), region = 40  ;;  %s1335_s7 = sshll.u32 (!%p1416_p10), %s236_s25, 4 }
  0x70   : > { %s237_s18 = scalar_lea.sflag (!%p1416_p10), [#allocation3], %s236_s25  ;;  %s240_s6 = scalar_lea.vmem (!%p1416_p10), [#allocation2], %s1335_s7 }
  0x76   : > { %1080 = dma.done.wait (%p1417_p2), %s237_s18, 256  }
  0x77   : > { %1082 = vsyncadd (%p1417_p2), %s237_s18, 4294967040  ;;  %p1418_p13 = scmp.eq.s32.totalorder %s1193_s22, 0 }
  0x79   : > { %1084 = dma.done.wait (%p1418_p13), [#allocation5], 1280   ;;  %p1419_p3 = pmov %p1418_p13 }
  0x7a   : > { %v1142_v0 = vmov 0.0   ;;  %vm1143_vm0 = vmmov 0   ;;  %v937_v1 = vld [vmem:[#allocation4] sm:$0xff]   ;;  %v938_v2 = vld [vmem:[#allocation4 + $0x8] sm:$0xff]   ;;  %v939_v5 = vld [vmem:[#allocation6] sm:$0xff]   ;;  %vm311_vm1 = vcmask 261120  }
  0x7b   : > { %1086 = vsyncadd (%p1419_p3), [#allocation5], 4294966016  ;;  %785 = vmatprep.subr.bf16.mxu0 %v1142_v0  ;;  %789 = vmatprep.mubr.msk.bf16.mxu0 %vm1143_vm0, %v1142_v0  ;;  %v285_v3 = vld [vmem:[%s240_s6] sm:$0xff]  ;;  %v286_v4 = vld [vmem:[%s240_s6 + $0x8] sm:$0xff]  ;;  %s1353_s16 = scalar_lea.vmem [#allocation7], %s1335_s7   ;;  %p1420_p6 = scmp.ne.s32.totalorder %s1412_s29, 0 }
  0x7c   : > { %793 = vmatprep.subr.bf16.mxu1 %v1142_v0  ;;  %809 = vmatprep.mubr.msk.bf16.mxu1 %vm1143_vm0, %v1142_v0  ;;  %v287_v6 = vpack.c.bf16 %v286_v4, %v285_v3  ;;  %v940_v7 = vld [vmem:[#allocation6 + $0x8] sm:$0xff]   ;;  %v941_v8 = vld [vmem:[#allocation6 + $0x10] sm:$0xff]   ;;  %v942_v9 = vld [vmem:[#allocation6 + $0x18] sm:$0xff]   ;;  %s753_s17 = sshll.u32 (%p1420_p6), %s1193_s22, 1  ;;  %s770_s21 = sshll.u32 (%p1420_p6), %s1193_s22, 4 }
  0x7d   : > { %786 = vmatpush3.bf16.msra.mxu0 %v937_v1  ;;  %794 = vmatpush3.bf16.msra.mxu1 %v939_v5  ;;  %v943_v10 = vld [vmem:[#allocation6 + $0x20] sm:$0xff]   ;;  %v944_v11 = vld [vmem:[#allocation6 + $0x28] sm:$0xff]   ;;  %v945_v12 = vld [vmem:[#allocation6 + $0x30] sm:$0xff]   ;;  %s481_s9 = ssub.s32 (%p1420_p6), 3, %s753_s17  ;;  %s1364_s13 = scalar_lea.vmem (%p1420_p6), %s1406_s5, %s770_s21  }
  0x7e   : > { %787 = vmatprep.subr.bf16.mxu0 %v1142_v0  ;;  %795 = vmatprep.subr.bf16.mxu1 %v1142_v0  ;;  %v946_v13 = vld [vmem:[#allocation6 + $0x38] sm:$0xff]   ;;  %v739_v14 = vld [vmem:[%s1403_s2] ss:$0 sm:$0xff]  ;;  %p482_p7 = scmp.lt.s32.totalorder (%p1420_p6), %s481_s9, 2 }
  0x7f   : > { %v743_v24 = vld [vmem:[%s1405_s4] ss:$0 sm:$0xff] }
  0x81   : > { %788 = vmatpush3.bf16.msra.mxu0 %v938_v2  ;;  %796 = vmatpush3.bf16.msra.mxu1 %v940_v7 }
  0x82   : > { %797 = vmatprep.subr.bf16.mxu1 %v1142_v0 }
  0x84   : > { %790 = vmatmul.mubr.msk.bf16.vlgmr.msra.gmra.mrb[0].mxu0 %vm311_vm1, %v287_v6 }
  0x85   : > { %798 = vmatpush3.bf16.msra.mxu1 %v941_v8 }
  0x86   : > { %799 = vmatprep.subr.bf16.mxu1 %v1142_v0 }
  0x89   : > { %800 = vmatpush3.bf16.msra.mxu1 %v942_v9 }
  0x8a   : > { %801 = vmatprep.subr.bf16.mxu1 %v1142_v0 }
  0x8d   : > { %802 = vmatpush3.bf16.msra.mxu1 %v943_v10 }
  0x8e   : > { %803 = vmatprep.subr.bf16.mxu1 %v1142_v0 }
  0x91   : > { %804 = vmatpush3.bf16.msra.mxu1 %v944_v11 }
  0x92   : > { %805 = vmatprep.subr.bf16.mxu1 %v1142_v0 }
  0x95   : > { %806 = vmatpush3.bf16.msra.mxu1 %v945_v12 }
  0x96   : > { %807 = vmatprep.subr.bf16.mxu1 %v1142_v0 }
  0x99   : > { %808 = vmatpush3.bf16.msra.mxu1 %v946_v13 }
 0x157   : > { %v349_v15 = vpop.f32.mrb[0].mxu0 }
 0x158   : > { %v350_v16 = vadd.f32 %v739_v14, %v349_v15  ;;  %v791_v17 = vpop.f32.mrb[1].mxu0 }
 0x159   : > { %v352_v18 = vpop.f32.mrb[2].mxu0 }
 0x15a   : > { %v353_v19 = vadd.f32 %v739_v14, %v352_v18  ;;  %v792_v20 = vpop.f32.mrb[3].mxu0  ;;  %v356_v21 = vmax.f32 %v350_v16, 0.0 }
 0x15c   : > { %v357_v22 = vmax.f32 %v353_v19, 0.0 }
 0x15e   : > { %v358_v23 = vpack.c.bf16 %v357_v22, %v356_v21 }
 0x160   : > { %810 = vmatmul.mubr.bf16.vlgmr.msra.gmra.mrb[0].mxu1 %v358_v23 }
 0x232   : > { %479 = sbr.rel (!%p1420_p6) target bundleno = 618 (0x26a), region = 56 }
 0x233   : > { %v464_v25 = vpop.f32.mrb[0].mxu1 }
 0x234   : > { %v465_v26 = vadd.f32 %v743_v24, %v464_v25  ;;  %v811_v27 = vpop.f32.mrb[1].mxu1 }
 0x235   : > { %v467_v28 = vpop.f32.mrb[2].mxu1 }
 0x236   : > { %471 = vst [vmem:[%s1353_s16] sm:$0xff] %v465_v26  ;;  %v468_v29 = vadd.f32 %v743_v24, %v467_v28  ;;  %v812_v30 = vpop.f32.mrb[3].mxu1 }
 0x238   : > { %472 = vst [vmem:[%s1353_s16 + $0x8] sm:$0xff] %v468_v29 }
 0x239   : > { %s1428_s9 = smov (!%p482_p7, %s481_s9), 2 }
 0x23a   : > { %s754_s14 = sshll.u32 %s1428_s9, 7 }
 0x23b   : > { %p757_p9 = scmp.eq.s32.totalorder %s754_s14, 0 }
 0x23c   : > { %s1370_s29 = sshrl.u32 (!%p757_p9), %s1428_s9, 1 }
 0x23d   : > { %490 = sbr.rel (%p757_p9) target bundleno = 618 (0x26a), region = 60  ;;  %p758_p12 = scmp.le.s32.totalorder (!%p757_p9), %s1370_s29, 0 }
 0x244   : > { %657 = sbr.rel (%p758_p12) target bundleno = 597 (0x255), region = 142  ;;  %s1103_s22 = smov (!%p758_p12), %s1364_s13  }
 0x245   : > { %s1107_s10 = smov (!%p758_p12), %s1353_s16   ;;  %s1111_s27 = smov (!%p758_p12), 0  }
 0x246   : > { %s1115_s24 = smov (!%p758_p12), 0  }
 0x24b LB: >> { %v554_v31 = vld [vmem:[%s1109_s10] sm:$0xff]  ;;  %v556_v32 = vld [vmem:[%s1109_s10 + $0x8] sm:$0xff]  ;;  %s558_s25 = sadd.s32 1, %s1113_s27  ;;  %s548_s24 = sadd.s32 1, %s1117_s24   ;;  %s1117_s24 = sphi %s1115_s24, %s548_s24   ;;  %s1113_s27 = sphi %s1111_s27, %s1112_s27   ;;  %s1109_s10 = sphi %s1107_s10, %s563_s10   ;;  %s1105_s22 = sphi %s1103_s22, %s564_s22  }
 0x24c   : >> { %555 = vst [vmem:[%s1105_s22] sm:$0xff] %v554_v31  ;;  %557 = vst [vmem:[%s1105_s22 + $0x8] sm:$0xff] %v556_v32  ;;  %p559_p0 = scmp.ge.s32.totalorder %s558_s25, %s1370_s29  ;;  %p547_p4 = scmp.ge.s32.totalorder %s548_s24, %s1370_s29 }
 0x24e   : >> { %s1430_s25 = smov (%p559_p0, %s558_s25), 0  ;;  %550 = sbr.rel (!%p547_p4) target bundleno = 587 (0x24b), region = 148 }
 0x24f   : >> { %s759_s7 = sshll.u32 %s1430_s25, 4  ;;  %s1112_s27 = smov %s1430_s25  }
 0x250   : >> { %s563_s10 = scalar_lea.vmem %s1353_s16, %s759_s7 [#allocation7]   ;;  %s564_s22 = scalar_lea.vmem %s1364_s13, %s759_s7  }
 0x255 PF: > { %s1380_s18 = sand.u32 1, %s1428_s9   ;;  %s771_s6 = sshll.u32 %s1370_s29, 4 }
 0x256   : > { %s569_s28 = scalar_lea.vmem %s1353_s16, %s771_s6 [#allocation7]   ;;  %s571_s30 = scalar_lea.vmem %s1364_s13, %s771_s6  }
 0x257   : > { %p764_p1 = scmp.le.s32.totalorder %s1380_s18, 0 }
 0x258   : > { %s1119_s8 = smov (!%p764_p1), %s571_s30   ;;  %s1123_s15 = smov (!%p764_p1), %s569_s28  }
 0x259   : > { %671 = sbr.rel (%p764_p1) target bundleno = 618 (0x26a), region = 153  ;;  %s1127_s17 = smov (!%p764_p1), 0  }
 0x25a   : > { %s1131_s21 = smov (!%p764_p1), 0  }
 0x260 LB: >> { %v581_v33 = vld [vmem:[%s1125_s15] sm:$0xff]  ;;  %s583_s9 = sadd.s32 1, %s1129_s17  ;;  %s575_s21 = sadd.s32 1, %s1133_s21   ;;  %s1133_s21 = sphi %s1131_s21, %s575_s21   ;;  %s1129_s17 = sphi %s1127_s17, %s1128_s17   ;;  %s1125_s15 = sphi %s1123_s15, %s588_s15   ;;  %s1121_s8 = sphi %s1119_s8, %s589_s8  }
 0x261   : >> { %582 = vst [vmem:[%s1121_s8] sm:$0xff] %v581_v33  ;;  %p584_p5 = scmp.ge.s32.totalorder %s583_s9, %s1380_s18  ;;  %p574_p8 = scmp.ge.s32.totalorder %s575_s21, %s1380_s18 }
 0x263   : >> { %s1432_s9 = smov (%p584_p5, %s583_s9), 0  ;;  %577 = sbr.rel (!%p574_p8) target bundleno = 608 (0x260), region = 159 }
 0x264   : >> { %s765_s16 = sshll.u32 %s1432_s9, 3  ;;  %s1128_s17 = smov %s1432_s9  }
 0x265   : >> { %s588_s15 = scalar_lea.vmem %s569_s28, %s765_s16 [#allocation7]   ;;  %s589_s8 = scalar_lea.vmem %s571_s30, %s765_s16  }
 0x26a PF: > { %p16_p11 = scmp.ge.s32.totalorder %s1196_s23, 4   ;;  %s1421_s18 = smov %s1093_s19 }
 0x26b   : > { %s1422_s19 = smov %s1097_s20  ;;  %s1423_s20 = smov %s1206_s26 }
 0x26c   : > { %s1424_s21 = smov %s1196_s23  ;;  %18 = sbr.rel (!%p16_p11) target bundleno = 4 (0x4), region = 170 }
 0x273   :  { %605 = vsyncpa [#allocation3], 1 }
 0x274   :  { %607 = vsyncpa [#allocation3 + $0x1], 1 }
 0x275   :  { %608 = vsyncpa [#allocation5], 1 }

</bundles_post_ra>
